<compile_context>
chip_gen: v7x
topology: tpu7x:2x2x1
jax: 0.10.0
libtpu: 0.0.40
codegen_flags: <defaults>
</compile_context>

<pallas_src>
import jax
import jax.numpy as jnp
from jax.experimental import pallas as pl
from jax.experimental.pallas import tpu as pltpu


def _round_up(x, m):
    return (x + m - 1) // m * m


# ----------------------------- Pallas kernels -----------------------------

def _stats_kernel(p_ref, w_ref, stats_ref):
    """Pass 1: conv matmul tile + per-channel sum / sum-of-squares accumulation.

    p_ref:     [TM, Kp]  bf16 im2col patch tile
    w_ref:     [Kp, Cp]  bf16 reshaped conv weight (resident across the grid)
    stats_ref: [2,  Cp]  f32 accumulator (same block every grid step):
               row 0 = sum_m y[m,c], row 1 = sum_m y[m,c]^2
    """
    @pl.when(pl.program_id(0) == 0)
    def _():
        stats_ref[...] = jnp.zeros_like(stats_ref)

    y = jnp.dot(p_ref[...], w_ref[...], preferred_element_type=jnp.float32)  # MXU
    s = jnp.sum(y, axis=0, keepdims=True)        # [1, Cp]   sublane reduce -> XLU
    ss = jnp.sum(y * y, axis=0, keepdims=True)   # [1, Cp]
    stats_ref[...] += jnp.concatenate([s, ss], axis=0)


def _norm_kernel(p_ref, w_ref, scale_ref, shift_ref, o_ref):
    """Pass 2: recompute conv tile on the MXU, fused scale/shift + ReLU."""
    y = jnp.dot(p_ref[...], w_ref[...], preferred_element_type=jnp.float32)
    out = jnp.maximum(y * scale_ref[...] + shift_ref[...], 0.0)
    o_ref[...] = out.astype(o_ref.dtype)


# ------------------------------- Wrapper ----------------------------------

def conv_bn_act(x_nchw, weight, gamma, beta, *, stride=1, padding=0, eps=1e-5,
                block_m=None):
    """x_nchw: [N, Cin, H, W]; weight: [Cout, Cin, KH, KW] (PyTorch conv layout)."""
    N, Cin, H, W = x_nchw.shape
    Cout, _, KH, KW = weight.shape
    OH = (H + 2 * padding - KH) // stride + 1
    OW = (W + 2 * padding - KW) // stride + 1

    # --- glue: im2col in plain JAX, bf16 for the heavy operands ---
    x = jnp.transpose(x_nchw, (0, 2, 3, 1))  # NHWC
    xp = jnp.pad(x, ((0, 0), (padding, padding), (padding, padding), (0, 0)))
    patches = []
    for kh in range(KH):
        for kw in range(KW):
            patches.append(
                xp[:, kh:kh + stride * OH:stride, kw:kw + stride * OW:stride, :])
    patches = jnp.concatenate(patches, axis=-1)           # [N, OH, OW, KH*KW*Cin]
    M = N * OH * OW
    Kdim = KH * KW * Cin
    patches = patches.reshape(M, Kdim).astype(jnp.bfloat16)

    # weight: [Cout,Cin,KH,KW] -> [KH,KW,Cin,Cout] -> [Kdim,Cout] (matches patch order)
    w2d = jnp.transpose(weight, (2, 3, 1, 0)).reshape(Kdim, Cout).astype(jnp.bfloat16)

    # --- padding to TPU-friendly shapes ---
    Kp = _round_up(Kdim, 128)
    Cp = _round_up(Cout, 128)

    # M tile: multiple of 16 (bf16 sublane packing), sized for a ~16 MiB data budget
    # (double-buffered bf16 patches + f32 output tile, resident weights/scale/shift),
    # which fits comfortably under the 32 MiB scoped-VMEM limit we request below and
    # is safe on v7x's 64 MiB physical VMEM.
    if block_m is None:
        budget = 16 * 1024 * 1024
        per_row = 2 * (Kp * 2 + Cp * 4)           # 2 buffers x (bf16 patches + f32 out)
        fixed = Kp * Cp * 2 + 4 * Cp * 4          # resident weight + scale/shift/stats
        block_m = max(16, (budget - fixed) // per_row)
    block_m = max(16, (min(int(block_m), _round_up(M, 16)) // 16) * 16)
    Mp = _round_up(M, block_m)
    n_tiles = Mp // block_m

    patches_p = jnp.pad(patches, ((0, Mp - M), (0, Kp - Kdim)))   # zero rows: no effect on stats
    w_p = jnp.pad(w2d, ((0, Kp - Kdim), (0, Cp - Cout)))

    vmem_limit = 32 * 1024 * 1024

    # --- pass 1: per-channel sum / sum-of-squares over all M tiles ---
    stats = pl.pallas_call(
        _stats_kernel,
        out_shape=jax.ShapeDtypeStruct((2, Cp), jnp.float32),
        grid=(n_tiles,),
        in_specs=[
            pl.BlockSpec((block_m, Kp), lambda i: (i, 0)),
            pl.BlockSpec((Kp, Cp), lambda i: (0, 0)),
        ],
        out_specs=pl.BlockSpec((2, Cp), lambda i: (0, 0)),
        compiler_params=pltpu.CompilerParams(
            dimension_semantics=("arbitrary",),        # cross-tile reduction
            vmem_limit_bytes=vmem_limit),
    )(patches_p, w_p)

    # --- fold BN (training-mode biased batch stats) + affine into scale/shift ---
    mean = stats[0] / M
    var = jnp.maximum(stats[1] / M - mean * mean, 0.0)
    gamma_p = jnp.pad(gamma.astype(jnp.float32), (0, Cp - Cout))   # padded lanes -> scale 0
    beta_p = jnp.pad(beta.astype(jnp.float32), (0, Cp - Cout))
    scale_vec = gamma_p * jax.lax.rsqrt(var + eps)
    shift_vec = beta_p - mean * scale_vec
    scale = scale_vec.reshape(1, Cp)
    shift = shift_vec.reshape(1, Cp)

    # --- pass 2: recompute conv per tile, fused FMA + ReLU ---
    out_p = pl.pallas_call(
        _norm_kernel,
        out_shape=jax.ShapeDtypeStruct((Mp, Cp), jnp.float32),
        grid=(n_tiles,),
        in_specs=[
            pl.BlockSpec((block_m, Kp), lambda i: (i, 0)),
            pl.BlockSpec((Kp, Cp), lambda i: (0, 0)),
            pl.BlockSpec((1, Cp), lambda i: (0, 0)),
            pl.BlockSpec((1, Cp), lambda i: (0, 0)),
        ],
        out_specs=pl.BlockSpec((block_m, Cp), lambda i: (i, 0)),
        compiler_params=pltpu.CompilerParams(
            dimension_semantics=("parallel",),         # independent tiles (2 TCs on v7x)
            vmem_limit_bytes=vmem_limit),
    )(patches_p, w_p, scale, shift)

    out = out_p[:M, :Cout].reshape(N, OH, OW, Cout)
    return jnp.transpose(out, (0, 3, 1, 2))            # back to NCHW


# ------------------------------ Reference ----------------------------------

def _reference(x_nchw, weight, gamma, beta, *, stride, padding, eps):
    # bf16-round the conv operands to match the kernel's MXU inputs (f32 accumulate).
    xb = x_nchw.astype(jnp.bfloat16).astype(jnp.float32)
    wb = weight.astype(jnp.bfloat16).astype(jnp.float32)
    y = jax.lax.conv_general_dilated(
        xb, wb,
        window_strides=(stride, stride),
        padding=[(padding, padding), (padding, padding)],
        dimension_numbers=("NCHW", "OIHW", "NCHW"),
        preferred_element_type=jnp.float32,
        precision=jax.lax.Precision.HIGHEST)
    mean = jnp.mean(y, axis=(0, 2, 3), keepdims=True)
    var = jnp.mean((y - mean) ** 2, axis=(0, 2, 3), keepdims=True)
    y = (y - mean) * jax.lax.rsqrt(var + eps)
    y = y * gamma.reshape(1, -1, 1, 1) + beta.reshape(1, -1, 1, 1)
    return jnp.maximum(y, 0.0)


if __name__ == "__main__":
    # ConvBnAct(in_channel=4, out_channel=8, kernel_size=3, stride=1, padding=1,
    #           bias=False, act='relu', groups=1)
    N, Cin, H, W = 2, 4, 16, 16
    Cout, K, stride, padding = 8, 3, 1, 1
    eps = 1e-5

    key = jax.random.PRNGKey(0)
    kx, kw = jax.random.split(key)
    x = jax.random.normal(kx, (N, Cin, H, W), dtype=jnp.float32)
    fan_in = Cin * K * K
    weight = jax.random.normal(kw, (Cout, Cin, K, K), dtype=jnp.float32) / jnp.sqrt(fan_in)
    gamma = jnp.ones((Cout,), jnp.float32)   # BatchNorm2d default affine init
    beta = jnp.zeros((Cout,), jnp.float32)

    # block_m=128 forces 4 M-tiles so the cross-tile stats reduction path is exercised.
    out = conv_bn_act(x, weight, gamma, beta, stride=stride, padding=padding,
                      eps=eps, block_m=128)
    out = jax.block_until_ready(out)

    ref = _reference(x, weight, gamma, beta, stride=stride, padding=padding, eps=eps)
    assert out.shape == (N, Cout, H, W), out.shape
    err = float(jnp.max(jnp.abs(out - ref)))
    assert jnp.allclose(out, ref, rtol=1e-3, atol=1e-3), err

    print("KERNEL_OK")
</pallas_src>

<mosaic_0001>
module attributes {stable_mosaic.version = 11 : i64} {
  func.func @_stats_kernel(%arg0: i32, %arg1: memref<128x128xbf16, #tpu.memory_space<vmem>>, %arg2: memref<128x128xbf16, #tpu.memory_space<vmem>>, %arg3: memref<2x128xf32, #tpu.memory_space<vmem>>) attributes {dimension_semantics = [#tpu.dimension_semantics<arbitrary>], iteration_bounds = array<i64: 4>, scalar_prefetch = 0 : i64, scratch_operands = 0 : i64, tpu.core_type = #tpu.core_type<tc>, window_params = [{transform_indices = @transform_0, window_bounds = array<i64: 128, 128>}, {pipeline_mode = #tpu.pipeline_mode<synchronous>, transform_indices = @transform_1, window_bounds = array<i64: 128, 128>}, {pipeline_mode = #tpu.pipeline_mode<synchronous>, transform_indices = @transform_2, window_bounds = array<i64: 2, 128>}]} {
    %c0_i32 = arith.constant 0 : i32
    %0 = arith.cmpi eq, %arg0, %c0_i32 : i32
    %1 = arith.extui %0 : i1 to i32
    %c0_i32_0 = arith.constant 0 : i32
    %2 = arith.cmpi ne, %1, %c0_i32_0 : i32
    scf.if %2 {
      %cst_10 = arith.constant 0.000000e+00 : f32
      %15 = vector.broadcast %cst_10 : f32 to vector<2x128xf32>
      %c0_11 = arith.constant 0 : index
      %c0_12 = arith.constant 0 : index
      %16 = vector.load %arg3[%c0_11, %c0_12] : memref<2x128xf32, #tpu.memory_space<vmem>>, vector<2x128xf32>
      tpu.vector_store %arg3[%c0_11, %c0_12], %15 {strides = array<i32>} : memref<2x128xf32, #tpu.memory_space<vmem>>, vector<2x128xf32>,
    } else {
    }
    %c0 = arith.constant 0 : index
    %c0_1 = arith.constant 0 : index
    %3 = vector.load %arg1[%c0, %c0_1] : memref<128x128xbf16, #tpu.memory_space<vmem>>, vector<128x128xbf16>
    %c0_2 = arith.constant 0 : index
    %c0_3 = arith.constant 0 : index
    %4 = vector.load %arg2[%c0_2, %c0_3] : memref<128x128xbf16, #tpu.memory_space<vmem>>, vector<128x128xbf16>
    %cst = arith.constant dense<0.000000e+00> : vector<128x128xf32>
    %5 = tpu.matmul %3, %4, %cst {dimension_numbers = #tpu.dot_dimension_numbers<[1], [0], [0], [1], [0, 0, 1, 1], [], []>} : vector<128x128xbf16>, vector<128x128xbf16>, vector<128x128xf32> -> vector<128x128xf32>
    %cst_4 = arith.constant dense<0.000000e+00> : vector<128xf32>
    %6 = vector.multi_reduction <add>, %5, %cst_4 [0] : vector<128x128xf32> to vector<128xf32>
    %7 = vector.shape_cast %6 : vector<128xf32> to vector<1x128xf32>
    %8 = arith.mulf %5, %5 : vector<128x128xf32>
    %cst_5 = arith.constant dense<0.000000e+00> : vector<128xf32>
    %9 = vector.multi_reduction <add>, %8, %cst_5 [0] : vector<128x128xf32> to vector<128xf32>
    %10 = vector.shape_cast %9 : vector<128xf32> to vector<1x128xf32>
    %c0_6 = arith.constant 0 : index
    %c0_7 = arith.constant 0 : index
    %11 = vector.load %arg3[%c0_6, %c0_7] : memref<2x128xf32, #tpu.memory_space<vmem>>, vector<2x128xf32>
    %12 = tpu.concatenate %7, %10 in 0 : vector<1x128xf32>, vector<1x128xf32> -> vector<2x128xf32>
    %13 = arith.addf %11, %12 : vector<2x128xf32>
    %c0_8 = arith.constant 0 : index
    %c0_9 = arith.constant 0 : index
    %14 = vector.load %arg3[%c0_8, %c0_9] : memref<2x128xf32, #tpu.memory_space<vmem>>, vector<2x128xf32>
    tpu.vector_store %arg3[%c0_8, %c0_9], %13 {strides = array<i32>} : memref<2x128xf32, #tpu.memory_space<vmem>>, vector<2x128xf32>,
    return
  }
  func.func @transform_0(%arg0: i32) -> (i32, i32) {
    %c0_i32 = arith.constant 0 : i32
    %c0_i32_0 = arith.constant 0 : i32
    return %arg0, %c0_i32 : i32, i32
  }
  func.func @transform_1(%arg0: i32) -> (i32, i32) {
    %c0_i32 = arith.constant 0 : i32
    %c0_i32_0 = arith.constant 0 : i32
    %c0_i32_1 = arith.constant 0 : i32
    return %c0_i32, %c0_i32_0 : i32, i32
  }
  func.func @transform_2(%arg0: i32) -> (i32, i32) {
    %c0_i32 = arith.constant 0 : i32
    %c0_i32_0 = arith.constant 0 : i32
    %c0_i32_1 = arith.constant 0 : i32
    return %c0_i32, %c0_i32_0 : i32, i32
  }
}

</mosaic_0001>

<bundles_post_ra>
// kernel: tpu_custom_call.1
= control target key start
LH: loop header
LB: loop body
LE: loop exit
PB: predicated region body
PF: predicated region fallthrough
CT: control target
= control target key end

     0   :  { %7 = vsyncpa [#allocation3], 0  ;;  %s1027_s0 = inlined_call_operand.hbm [shape: bf16[512,128], index: 0, kind: input, shape index: {}]   ;;  %s1028_s1 = inlined_call_operand.hbm [shape: bf16[128,128], index: 1, kind: input, shape index: {}]   ;;  %s1029_s2 = inlined_call_operand.hbm [shape: f32[2,128], index: 2, kind: output, shape index: {}]  }
   0x1   :  { %9 = vsyncpa [#allocation3 + $0x1], 0 }
   0x2   :  { %10 = vsyncpa [#allocation6], 0 }
   0x3   :  { %11 = vsyncpa [#allocation4], 0  ;;  %s848_s9 = smov 0   ;;  %s850_s10 = smov 0  }
   0x4   :  { %s852_s11 = smov 0   ;;  %s854_s12 = smov 0  }
   0x5 LB: > { %s867_s13 = sadd.s32 4294967295, %s825_s12   ;;  %p37_p0 = scmp.ne.s32.totalorder %s817_s10, %s813_s9  ;;  %s825_s12 = sphi %s854_s12, %s1045_s12   ;;  %s821_s11 = sphi %s852_s11, %s1044_s11   ;;  %s817_s10 = sphi %s850_s10, %s1043_s10   ;;  %s813_s9 = sphi %s848_s9, %s1042_s9  }
   0x6   : > { %p1030_p1 = scmp.eq.s32.totalorder %s867_s13, 0  ;;  %p528_p2 = scmp.ge.s32.totalorder %s825_s12, 1 }
   0x7   : > { %p90_p3 = scmp.lt.s32.totalorder %s825_s12, 5  ;;  %s827_s16 = smov [#allocation5]  }
   0x8   : > { %p876_p5 = por %p1030_p1, %p37_p0  ;;  %s102_s17 = sshll.u32 %s827_s16, 4  ;;  %s103_s17 = int_to_ptr.vmem [resolvable:$true] %s102_s17 }
   0x9   : > { %p880_p6 = pnand %p528_p2, %p90_p3  ;;  %s893_s19 = sadd.s32 1, %s825_s12  }
   0xa   : > { %s1033_s14 = scalar_select %p876_p5, 1, 0 }
   0xb   : > { %s1034_s15 = scalar_select %p880_p6, 1, 0 }
   0xc   : > { %p633_p7 = pneg %p880_p6  ;;  %s24_s20 = sadd.s32 1, %s821_s11 }
   0xd   : > { %s21_s21 = ssub.s32 %s825_s12, %s893_s19  ;;  %s699_s24 = scalar_lea.hbm %s1028_s1, 1024 }
   0xe   : > { %p888_p8 = pnand %p633_p7, %p1030_p1  ;;  %p700_p9 = scmp.ne.s32.totalorder %s1028_s1, %s699_s24 }
   0xf   : > { %p706_p13 = scmp.lt.u32.totalorder %s699_s24, %s1028_s1 }
  0x10   : > { %p701_p10 = pneg %p888_p8 }
  0x12   : > { %p702_p11 = pnand %p701_p10, %p700_p9 }
  0x14   : > { %p703_p12 = pneg %p702_p11 }
  0x16   : > { %p708_p0 = pnand %p706_p13, %p703_p12 }
  0x18   : > { %711 = shalt.err (!%p708_p0)
}
  0x19   : > { %s712_s29 = scalar_lea.vmem %s103_s17, 1024  ;;  %p720_p4 = scmp.lt.s32.totalorder %s103_s17, %s103_s17 }
  0x1a   : > { %p713_p2 = scmp.ne.s32.totalorder %s103_s17, %s712_s29  ;;  %p721_p1 = scmp.lt.s32.totalorder %s712_s29, %s712_s29 }
  0x1c   : > { %p715_p3 = pnand %p713_p2, %p701_p10  ;;  %p722_p5 = por %p721_p1, %p720_p4 }
  0x1e   : > { %p716_p7 = pneg %p715_p3 }
  0x20   : > { %p723_p6 = pnand %p722_p5, %p716_p7 }
  0x22   : > { %726 = shalt.err (!%p723_p6)
}
  0x23   : > { %s828_s30 = smov 64   ;;  %s829_s3 = smov 4  }
  0x24   : > { %636 = dma.hbm_to_vmem [thread:$0]  (!%p888_p8), %s1028_s1, 1024, %s103_s17, [#allocation6], %s828_s30, %s828_s30, %s829_s3  }
  0x25   : > { %p22_p1 = scmp.eq.s32.totalorder %s21_s21, 0  ;;  %p31_p4 = scmp.ne.s32.totalorder %s821_s11, %s817_s10 }
  0x26   : > { %p32_p5 = scmp.eq.s32.totalorder %s825_s12, 0  ;;  %p642_p6 = scmp.lt.s32.totalorder %s825_s12, 4 }
  0x27   : > { %s922_s6 = scalar_select %p22_p1, %s821_s11, %s24_s20  }
  0x28   : > { %p33_p9 = por %p32_p5, %p31_p4  ;;  %s116_s7 = sand.u32 1, %s821_s11  }
  0x29   : > { %s531_s8 = sshll.u32 %s116_s7, 6  ;;  %s558_s9 = sshll.u32 %s825_s12, 10 }
  0x2a   : > { %s929_s18 = scalar_lea.hbm %s1027_s0, %s558_s9  ;;  %s120_s17 = scalar_lea.vmem [#allocation2], %s531_s8 }
  0x2b   : > { %s127_s21 = sshll.u32 %s120_s17, 4  ;;  %p933_p8 = pnand %p642_p6, %p33_p9  ;;  %s931_s21 = int_to_ptr.vmem [resolvable:$true] %s127_s21 }
  0x2c   : > { %s937_s12 = scalar_lea.sflag [#allocation3], %s116_s7  ;;  %s727_s23 = scalar_lea.hbm %s929_s18, 1024 }
  0x2d   : > { %p728_p10 = scmp.ne.s32.totalorder %s929_s18, %s727_s23  ;;  %p729_p11 = pneg %p933_p8 }
  0x2e   : > { %s732_s26 = scalar_lea.hbm %s1027_s0, 4096  ;;  %p733_p0 = scmp.lt.u32.totalorder %s929_s18, %s1027_s0 }
  0x2f   : > { %p730_p12 = pnand %p729_p11, %p728_p10  ;;  %p734_p2 = scmp.lt.u32.totalorder %s732_s26, %s727_s23 }
  0x30   : > { %p736_p7 = scmp.lt.u32.totalorder %s727_s23, %s929_s18 }
  0x31   : > { %p731_p13 = pneg %p730_p12  ;;  %p735_p3 = por %p734_p2, %p733_p0 }
  0x33   : > { %p737_p1 = por %p736_p7, %p735_p3 }
  0x35   : > { %p738_p4 = pnand %p737_p1, %p731_p13 }
  0x37   : > { %741 = shalt.err (!%p738_p4)
}
  0x38   : > { %s742_s29 = scalar_lea.vmem %s931_s21, 1024  ;;  %s830_s4 = smov [#allocation2]  }
  0x39   : > { %p743_p5 = scmp.ne.s32.totalorder %s931_s21, %s742_s29  ;;  %s747_s5 = sshll.u32 %s830_s4, 4  ;;  %s748_s5 = int_to_ptr.vmem [resolvable:$false] %s747_s5 }
  0x3a   : > { %s749_s7 = scalar_lea.vmem %s748_s5, 2048  ;;  %p750_p10 = scmp.lt.s32.totalorder %s931_s21, %s748_s5 }
  0x3b   : > { %p745_p6 = pnand %p743_p5, %p729_p11  ;;  %p751_p12 = scmp.lt.s32.totalorder %s749_s7, %s742_s29 }
  0x3d   : > { %p746_p9 = pneg %p745_p6  ;;  %p752_p0 = por %p751_p12, %p750_p10 }
  0x3f   : > { %p753_p2 = pnand %p752_p0, %p746_p9 }
  0x41   : > { %756 = shalt.err (!%p753_p2)
}
  0x42   : > { %640 = dma.hbm_to_vmem [thread:$0]  (!%p933_p8), %s929_s18, 1024, %s931_s21, %s937_s12, %s828_s30, %s828_s30, %s829_s3  }
  0x43   : > { %p1037_p11 = scmp.ne.s32.totalorder %s1034_s15, 0 }
  0x44   : > { %s141_s8 = sand.u32 (!%p1037_p11), 1, %s817_s10   ;;  %p1038_p13 = scmp.ne.s32.totalorder (!%p1037_p11), %s1033_s14, 0 }
  0x45   : > { %139 = sbr.rel (%p1037_p11) target bundleno = 399 (0x18f), region = 28  ;;  %s535_s9 = sshll.u32 (!%p1037_p11), %s141_s8, 6 }
  0x46   : > { %s142_s16 = scalar_lea.sflag (!%p1037_p11), [#allocation3], %s141_s8  ;;  %s971_s22 = scalar_lea.vmem (!%p1037_p11), [#allocation2], %s535_s9 }
  0x4c   : > { %800 = dma.done.wait (%p1038_p13), %s142_s16, 1024  }
  0x4d   : > { %802 = vsyncadd (%p1038_p13), %s142_s16, 4294966272  ;;  %p1039_p3 = scmp.eq.s32.totalorder %s867_s13, 0 }
  0x4f   : > { %804 = dma.done.wait (%p1039_p3), [#allocation6], 1024   ;;  %p1040_p8 = pmov %p1039_p3 }
  0x50   : > { %p1041_p7 = scmp.ne.s32.totalorder %s867_s13, 0 }
  0x51   : > { %806 = vsyncadd (%p1040_p8), [#allocation6], 4294966272  ;;  %v831_v0 = vmov (!%p1041_p7), 0.0  }
  0x52   : > { %170 = sbr.rel (%p1041_p7) target bundleno = 89 (0x59), region = 40  ;;  %171 = vst [vmem:[#allocation7] sm:$0x3] (!%p1041_p7), %v831_v0 }
  0x59 PF: > { %v683_v1 = vld [vmem:[#allocation5] sm:$0xff]   ;;  %v684_v2 = vld [vmem:[#allocation5 + $0x8] sm:$0xff]   ;;  %v685_v3 = vld [vmem:[#allocation5 + $0x10] sm:$0xff]   ;;  %vm456_vm0 = vcmask 1040384   ;;  %s832_s14 = smov [#allocation7]   ;;  %p644_p1 = scmp.eq.s32.totalorder %s867_s13, 3 }
  0x5a   : > { %575 = vmatprep.subr.bf16.mxu0 %v683_v1  ;;  %607 = vmatprep.subr.bf16.mxu1 %v683_v1  ;;  %v686_v4 = vld [vmem:[#allocation5 + $0x18] sm:$0xff]   ;;  %v691_v5 = vld [vmem:[%s971_s22] sm:$0xff]   ;;  %v688_v8 = vld [vmem:[#allocation5 + $0x28] sm:$0xff]   ;;  %s467_s15 = sshll.u32 %s832_s14, 4  ;;  %s468_s15 = int_to_ptr.vmem [resolvable:$true] %s467_s15 }
  0x5b   : > { %576 = vmatpush3.bf16.msra.mxu0 %v683_v1  ;;  %615 = vmatpush3.bf16.msra.mxu1 %v683_v1  ;;  %v687_v6 = vld [vmem:[#allocation5 + $0x20] sm:$0xff]   ;;  %v689_v9 = vld [vmem:[#allocation5 + $0x30] sm:$0xff]   ;;  %v690_v10 = vld [vmem:[#allocation5 + $0x38] sm:$0xff]   ;;  %s757_s30 = scalar_lea.vmem %s468_s15, 32  ;;  %p764_p9 = scmp.lt.s32.totalorder %s468_s15, %s468_s15 }
  0x5c   : > { %577 = vmatprep.subr.bf16.mxu0 %v684_v2  ;;  %608 = vmatprep.subr.bf16.mxu1 %v684_v2  ;;  %v695_v7 = vld [vmem:[%s971_s22 + $0x20] sm:$0xff]   ;;  %v692_v11 = vld [vmem:[%s971_s22 + $0x8] sm:$0xff]   ;;  %v693_v13 = vld [vmem:[%s971_s22 + $0x10] sm:$0xff]   ;;  %p758_p4 = scmp.ne.s32.totalorder %s468_s15, %s757_s30  ;;  %p765_p10 = scmp.lt.s32.totalorder %s757_s30, %s757_s30 }
  0x5d   : > { %591 = vmatprep.mubr.bf16.mxu0 %v691_v5  ;;  %599 = vmatprep.mubr.bf16.mxu1 %v695_v7  ;;  %v696_v12 = vld [vmem:[%s971_s22 + $0x28] sm:$0xff]   ;;  %v697_v14 = vld [vmem:[%s971_s22 + $0x30] sm:$0xff]   ;;  %v694_v15 = vld [vmem:[%s971_s22 + $0x18] sm:$0xff]  }
  0x5e   : > { %v698_v16 = vld [vmem:[%s971_s22 + $0x38] sm:$0xff]   ;;  %p759_p5 = pnand %p758_p4, %p644_p1  ;;  %p766_p12 = por %p765_p10, %p764_p9 }
  0x5f   : > { %578 = vmatpush3.bf16.msra.mxu0 %v684_v2  ;;  %616 = vmatpush3.bf16.msra.mxu1 %v684_v2 }
  0x60   : > { %579 = vmatprep.subr.bf16.mxu0 %v685_v3  ;;  %609 = vmatprep.subr.bf16.mxu1 %v685_v3  ;;  %p760_p6 = pneg %p759_p5 }
  0x62   : > { %p767_p0 = pnand %p766_p12, %p760_p6 }
  0x63   : > { %580 = vmatpush3.bf16.msra.mxu0 %v685_v3  ;;  %617 = vmatpush3.bf16.msra.mxu1 %v685_v3 }
  0x64   : > { %581 = vmatprep.subr.bf16.mxu0 %v686_v4  ;;  %610 = vmatprep.subr.bf16.mxu1 %v686_v4 }
  0x67   : > { %582 = vmatpush3.bf16.msra.mxu0 %v686_v4  ;;  %618 = vmatpush3.bf16.msra.mxu1 %v686_v4 }
  0x68   : > { %583 = vmatprep.subr.bf16.mxu0 %v687_v6  ;;  %611 = vmatprep.subr.bf16.mxu1 %v687_v6 }
  0x6b   : > { %584 = vmatpush3.bf16.msra.mxu0 %v687_v6  ;;  %619 = vmatpush3.bf16.msra.mxu1 %v687_v6 }
  0x6c   : > { %585 = vmatprep.subr.bf16.mxu0 %v688_v8  ;;  %612 = vmatprep.subr.bf16.mxu1 %v688_v8 }
  0x6f   : > { %586 = vmatpush3.bf16.msra.mxu0 %v688_v8  ;;  %620 = vmatpush3.bf16.msra.mxu1 %v688_v8 }
  0x70   : > { %587 = vmatprep.subr.bf16.mxu0 %v689_v9  ;;  %613 = vmatprep.subr.bf16.mxu1 %v689_v9 }
  0x73   : > { %588 = vmatpush3.bf16.msra.mxu0 %v689_v9  ;;  %621 = vmatpush3.bf16.msra.mxu1 %v689_v9 }
  0x74   : > { %589 = vmatprep.subr.bf16.mxu0 %v690_v10  ;;  %614 = vmatprep.subr.bf16.mxu1 %v690_v10 }
  0x77   : > { %590 = vmatpush3.bf16.msra.mxu0 %v690_v10  ;;  %622 = vmatpush3.bf16.msra.mxu1 %v690_v10 }
  0x7a   : > { %592 = vmatmul.mubr.bf16.vlgmr.msra.gmra.mrb[0].mxu0 %v692_v11  ;;  %600 = vmatmul.mubr.bf16.vlgmr.msra.gmra.mrb[0].mxu1 %v696_v12 }
  0x7b   : > { %595 = vmatprep.mubr.bf16.mxu0 %v693_v13  ;;  %603 = vmatprep.mubr.bf16.mxu1 %v697_v14 }
  0x82   : > { %596 = vmatmul.mubr.bf16.gmra.mrb[4].mxu0 %v694_v15  ;;  %604 = vmatmul.mubr.bf16.gmra.mrb[4].mxu1 %v698_v16 }
 0x14d   : > { %v593_v17 = vpop.f32.mrb[0].mxu0  ;;  %v601_v18 = vpop.f32.mrb[0].mxu1 }
 0x14e   : > { %v334_v19 = vpop.f32.mrb[1].mxu0  ;;  %v366_v20 = vpop.f32.mrb[1].mxu1  ;;  %v420_v28 = vmul.f32 %v593_v17, %v593_v17  ;;  %v428_v60 = vmul.f32 %v601_v18, %v601_v18 }
 0x14f   : > { %v594_v21 = vpop.f32.mrb[2].mxu0  ;;  %v602_v22 = vpop.f32.mrb[2].mxu1  ;;  %v418_v25 = vmul.f32 %v334_v19, %v334_v19  ;;  %v426_v54 = vmul.f32 %v366_v20, %v366_v20 }
 0x150   : > { %v337_v23 = vpop.f32.mrb[3].mxu0  ;;  %v369_v24 = vpop.f32.mrb[3].mxu1  ;;  %v421_v31 = vmul.f32 %v594_v21, %v594_v21  ;;  %v429_v63 = vmul.f32 %v602_v22, %v602_v22 }
 0x151   : > { %v397_v26 = vadd.f32 %v337_v23, %v334_v19  ;;  %v419_v27 = vmul.f32 %v337_v23, %v337_v23  ;;  %v427_v59 = vmul.f32 %v369_v24, %v369_v24 }
 0x153   : > { %v398_v29 = vadd.f32 %v593_v17, %v397_v26  ;;  %v434_v30 = vadd.f32 %v419_v27, %v418_v25  ;;  %v455_v27 = vld [vmem:[#allocation7] sm:$0x3] }
 0x155   : > { %v435_v32 = vadd.f32 %v434_v30, %v420_v28  ;;  %v597_v33 = vpop.f32.mrb[4].mxu0  ;;  %v399_v34 = vadd.f32 %v594_v21, %v398_v29  ;;  %v605_v35 = vpop.f32.mrb[4].mxu1 }
 0x156   : > { %v350_v36 = vpop.f32.mrb[5].mxu0  ;;  %v382_v37 = vpop.f32.mrb[5].mxu1  ;;  %v424_v48 = vmul.f32 %v597_v33, %v597_v33  ;;  %v432_v8 = vmul.f32 %v605_v35, %v605_v35 }
 0x157   : > { %v400_v38 = vadd.f32 %v399_v34, %v350_v36  ;;  %v422_v39 = vmul.f32 %v350_v36, %v350_v36  ;;  %v436_v40 = vadd.f32 %v435_v32, %v421_v31  ;;  %v598_v41 = vpop.f32.mrb[6].mxu0  ;;  %v606_v42 = vpop.f32.mrb[6].mxu1  ;;  %v430_v2 = vmul.f32 %v382_v37, %v382_v37 }
 0x158   : > { %v353_v43 = vpop.f32.mrb[7].mxu0  ;;  %v385_v44 = vpop.f32.mrb[7].mxu1  ;;  %v425_v51 = vmul.f32 %v598_v41, %v598_v41  ;;  %v433_v11 = vmul.f32 %v606_v42, %v606_v42 }
 0x159   : > { %v437_v45 = vadd.f32 %v436_v40, %v422_v39  ;;  %v401_v46 = vadd.f32 %v400_v38, %v353_v43  ;;  %v423_v47 = vmul.f32 %v353_v43, %v353_v43  ;;  %v431_v7 = vmul.f32 %v385_v44, %v385_v44 }
 0x15b   : > { %v402_v49 = vadd.f32 %v597_v33, %v401_v46  ;;  %v438_v50 = vadd.f32 %v437_v45, %v423_v47 }
 0x15d   : > { %v439_v52 = vadd.f32 %v438_v50, %v424_v48  ;;  %v403_v53 = vadd.f32 %v598_v41, %v402_v49 }
 0x15f   : > { %v404_v55 = vadd.f32 %v403_v53, %v366_v20  ;;  %v440_v56 = vadd.f32 %v439_v52, %v425_v51 }
 0x161   : > { %v441_v57 = vadd.f32 %v440_v56, %v426_v54  ;;  %v405_v58 = vadd.f32 %v404_v55, %v369_v24 }
 0x163   : > { %v406_v61 = vadd.f32 %v601_v18, %v405_v58  ;;  %v442_v62 = vadd.f32 %v441_v57, %v427_v59 }
 0x165   : > { %v443_v0 = vadd.f32 %v442_v62, %v428_v60  ;;  %v407_v1 = vadd.f32 %v602_v22, %v406_v61 }
 0x167   : > { %v408_v3 = vadd.f32 %v407_v1, %v382_v37  ;;  %v444_v4 = vadd.f32 %v443_v0, %v429_v63 }
 0x169   : > { %v445_v5 = vadd.f32 %v444_v4, %v430_v2  ;;  %v409_v6 = vadd.f32 %v408_v3, %v385_v44 }
 0x16b   : > { %v410_v9 = vadd.f32 %v605_v35, %v409_v6  ;;  %v446_v10 = vadd.f32 %v445_v5, %v431_v7 }
 0x16d   : > { %v411_v12 = vadd.f32 %v606_v42, %v410_v9  ;;  %v447_v13 = vadd.f32 %v446_v10, %v432_v8 }
 0x16f   : > { %v412_v14 = vrot.slane %v411_v12, 4  ;;  %v448_v15 = vadd.f32 %v447_v13, %v433_v11 }
 0x171   : > { %v413_v16 = vadd.f32 %v412_v14, %v411_v12  ;;  %v449_v17 = vrot.slane %v448_v15, 4 }
 0x173   : > { %v414_v18 = vrot.slane %v413_v16, 2  ;;  %v450_v19 = vadd.f32 %v449_v17, %v448_v15 }
 0x175   : > { %v415_v20 = vadd.f32 %v414_v18, %v413_v16  ;;  %v451_v21 = vrot.slane %v450_v19, 2 }
 0x177   : > { %v416_v22 = vrot.slane %v415_v20, 1  ;;  %v452_v23 = vadd.f32 %v451_v21, %v450_v19 }
 0x179   : > { %v453_v24 = vrot.slane %v452_v23, 1  ;;  %v417_v25 = vadd.f32 %v416_v22, %v415_v20 }
 0x17b   : > { %v454_v26 = vadd.f32 %v453_v24, %v452_v23 }
 0x17d   : > { %v457_v28 = vsel %vm456_vm0, %v417_v25, %v454_v26 }
 0x17e   : > { %v458_v29 = vadd.f32 %v457_v28, %v455_v27 }
 0x180   : > { %459 = vst [vmem:[#allocation7] sm:$0x3] %v458_v29 }
 0x181   : > { %770 = shalt.err (!%p767_p0)
}
 0x182   : > { %s771_s17 = scalar_lea.hbm %s1029_s2, 32 }
 0x183   : > { %p772_p2 = scmp.ne.s32.totalorder %s1029_s2, %s771_s17  ;;  %p777_p3 = scmp.lt.u32.totalorder %s771_s17, %s1029_s2 }
 0x185   : > { %p773_p11 = pnand %p772_p2, %p644_p1 }
 0x187   : > { %p774_p13 = pneg %p773_p11 }
 0x189   : > { %p779_p8 = pnand %p777_p3, %p774_p13 }
 0x18b   : > { %782 = shalt.err (!%p779_p8)
}
 0x18c   : > { %630 = dma.vmem_to_hbm [thread:$0]  (%p644_p1), %s468_s15, 32, %s1029_s2, [#allocation4]  }
 0x18d   : > { %808 = dma.done.wait (%p644_p1), [#allocation4], 32  }
 0x18e   : > { %810 = vsyncadd (%p644_p1), [#allocation4], 4294967264 }
 0x18f PF: > { %p14_p7 = scmp.ge.s32.totalorder %s893_s19, 6   ;;  %s1042_s9 = smov %s817_s10 }
 0x190   : > { %s1043_s10 = smov %s821_s11  ;;  %s1044_s11 = smov %s922_s6 }
 0x191   : > { %s1045_s12 = smov %s893_s19  ;;  %16 = sbr.rel (!%p14_p7) target bundleno = 5 (0x5), region = 73 }
 0x198   :  { %480 = vsyncpa [#allocation3], 1 }
 0x199   :  { %482 = vsyncpa [#allocation3 + $0x1], 1 }
 0x19a   :  { %483 = vsyncpa [#allocation6], 1 }
 0x19b   :  { %484 = vsyncpa [#allocation4], 1 }
 0x19c   :  { %486 = vsyncpa [#allocation4 + $0x1], 1 }

</bundles_post_ra>
